<compile_context>
chip_gen: v7x
topology: tpu7x:2x2x1
jax: 0.10.0
libtpu: 0.0.40
codegen_flags: <defaults>
</compile_context>

<pallas_src>
import jax
import jax.numpy as jnp
import numpy as np
from jax.experimental import pallas as pl
from jax.experimental.pallas import tpu as pltpu


def _round_up(v, m):
    return ((v + m - 1) // m) * m


def _mlp_kernel(x_ref, w1_ref, b1_ref, w2_ref, b2_ref, o_ref, acc_ref):
    """One (batch-tile, K-tile) grid step of relu(x @ w1 + b1) @ w2 + b2."""
    k = pl.program_id(1)

    @pl.when(k == 0)
    def _():
        acc_ref[...] = jnp.zeros_like(acc_ref)

    # fc1 partial product on the MXU: bf16 operands, f32 accumulation.
    acc_ref[...] += jnp.dot(x_ref[...], w1_ref[...],
                            preferred_element_type=jnp.float32)

    @pl.when(k == pl.num_programs(1) - 1)
    def _():
        # bias + ReLU in f32, then fc2 (bf16 operands, f32 accumulation).
        h = jnp.maximum(acc_ref[...] + b1_ref[...], 0.0)
        out = jnp.dot(h.astype(w2_ref.dtype), w2_ref[...],
                      preferred_element_type=jnp.float32)
        o_ref[...] = (out + b2_ref[...]).astype(o_ref.dtype)


def netalt_forward(x, w1, b1, w2, b2, *,
                   block_b=256, block_k=1024,
                   compute_dtype=jnp.bfloat16):
    """x: (B, input_size) float32. Weights pre-transposed to (in, out)."""
    B, in_dim = x.shape
    hidden = w1.shape[1]
    num_classes = w2.shape[1]

    # ---- tile sizes ---------------------------------------------------------
    # Batch tile: at least 8 sublanes (f32/bf16 friendly), at most block_b.
    tb = min(block_b, _round_up(B, 8))
    b_pad = _round_up(B, tb)

    # K (input-feature) tile: 128-lane multiple; a single step if it fits.
    in_lane = _round_up(in_dim, 128)
    tk = min(block_k, in_lane)
    in_pad = _round_up(in_dim, tk)

    hid_pad = _round_up(hidden, 128)
    nc_pad = _round_up(num_classes, 128)  # lane-dense output slab

    # ---- zero-pad + cast (zeros contribute nothing to the matmuls) ----------
    x_p = jnp.pad(x, ((0, b_pad - B), (0, in_pad - in_dim))).astype(compute_dtype)
    w1_p = jnp.pad(w1, ((0, in_pad - in_dim), (0, hid_pad - hidden))).astype(compute_dtype)
    w2_p = jnp.pad(w2, ((0, hid_pad - hidden), (0, nc_pad - num_classes))).astype(compute_dtype)
    b1_p = jnp.pad(b1, (0, hid_pad - hidden)).reshape(1, hid_pad).astype(jnp.float32)
    b2_p = jnp.pad(b2, (0, nc_pad - num_classes)).reshape(1, nc_pad).astype(jnp.float32)

    grid = (b_pad // tb, in_pad // tk)

    out = pl.pallas_call(
        _mlp_kernel,
        out_shape=jax.ShapeDtypeStruct((b_pad, nc_pad), jnp.float32),
        grid_spec=pltpu.PrefetchScalarGridSpec(
            num_scalar_prefetch=0,
            grid=grid,
            in_specs=[
                pl.BlockSpec((tb, tk), lambda b, k: (b, k)),            # x tile
                pl.BlockSpec((tk, hid_pad), lambda b, k: (k, 0)),       # w1 K-slab
                pl.BlockSpec((1, hid_pad), lambda b, k: (0, 0)),        # b1 (resident)
                pl.BlockSpec((hid_pad, nc_pad), lambda b, k: (0, 0)),   # w2 (resident)
                pl.BlockSpec((1, nc_pad), lambda b, k: (0, 0)),         # b2 (resident)
            ],
            out_specs=pl.BlockSpec((tb, nc_pad), lambda b, k: (b, 0)),
            scratch_shapes=[pltpu.VMEM((tb, hid_pad), jnp.float32)],    # fc1 accumulator
        ),
        compiler_params=pltpu.CompilerParams(
            dimension_semantics=("parallel", "arbitrary"),
            vmem_limit_bytes=48 * 1024 * 1024,
        ),
    )(x_p, w1_p, b1_p, w2_p, b2_p)

    return out[:B, :num_classes]


def init_params(key, input_size, hidden_size, num_classes):
    """Deterministic init mimicking nn.Linear default (uniform +/- 1/sqrt(fan_in)).
    Weights stored transposed: (in_features, out_features)."""
    k1, k2, k3, k4 = jax.random.split(key, 4)
    bound1 = 1.0 / np.sqrt(input_size)
    bound2 = 1.0 / np.sqrt(hidden_size)
    w1 = jax.random.uniform(k1, (input_size, hidden_size), jnp.float32,
                            -bound1, bound1)
    b1 = jax.random.uniform(k2, (hidden_size,), jnp.float32, -bound1, bound1)
    w2 = jax.random.uniform(k3, (hidden_size, num_classes), jnp.float32,
                            -bound2, bound2)
    b2 = jax.random.uniform(k4, (num_classes,), jnp.float32, -bound2, bound2)
    return w1, b1, w2, b2


def reference_forward(x, w1, b1, w2, b2, compute_dtype=jnp.bfloat16):
    """Same math with the same bf16 operand casts, f32 accumulation."""
    xd = x.astype(compute_dtype)
    w1d = w1.astype(compute_dtype)
    w2d = w2.astype(compute_dtype)
    h = jnp.dot(xd, w1d, preferred_element_type=jnp.float32) + b1
    h = jnp.maximum(h, 0.0)
    return jnp.dot(h.astype(compute_dtype), w2d,
                   preferred_element_type=jnp.float32) + b2


if __name__ == "__main__":
    # Small shapes consistent with the module: CHANNELS=3, spatial 16x16,
    # so input_size = 3*16*16 = 768; hidden=128; num_classes=10; batch=2.
    # (The spec's full sizes — input_size=3*1024, hidden=1000 — are handled by
    # the same padding/tiling path.)
    B, C, H, W = 2, 3, 16, 16
    input_size = C * H * W
    hidden_size = 128
    num_classes = 10

    key = jax.random.PRNGKey(0)
    kx, kp = jax.random.split(key)

    x_nchw = jax.random.normal(kx, (B, C, H, W), jnp.float32)
    x = x_nchw.reshape(B, -1)  # flatten NCHW row-major, same as torch .view

    w1, b1, w2, b2 = init_params(kp, input_size, hidden_size, num_classes)

    out = netalt_forward(x, w1, b1, w2, b2)
    out = jax.block_until_ready(out)

    ref = reference_forward(x, w1, b1, w2, b2)
    assert out.shape == (B, num_classes)
    np.testing.assert_allclose(np.asarray(out), np.asarray(ref),
                               atol=2e-2, rtol=2e-2)

    print("KERNEL_OK")
</pallas_src>

<mosaic_0001>
module attributes {stable_mosaic.version = 11 : i64} {
  func.func @_mlp_kernel(%arg0: i32, %arg1: i32, %arg2: memref<8x768xbf16, #tpu.memory_space<vmem>>, %arg3: memref<768x128xbf16, #tpu.memory_space<vmem>>, %arg4: memref<1x128xf32, #tpu.memory_space<vmem>>, %arg5: memref<128x128xbf16, #tpu.memory_space<vmem>>, %arg6: memref<1x128xf32, #tpu.memory_space<vmem>>, %arg7: memref<8x128xf32, #tpu.memory_space<vmem>>, %arg8: memref<8x128xf32, #tpu.memory_space<vmem>>) attributes {dimension_semantics = [#tpu.dimension_semantics<parallel>, #tpu.dimension_semantics<arbitrary>], iteration_bounds = array<i64: 1, 1>, scalar_prefetch = 0 : i64, scratch_operands = 1 : i64, tpu.core_type = #tpu.core_type<tc>, window_params = [{transform_indices = @transform_0, window_bounds = array<i64: 8, 768>}, {transform_indices = @transform_1, window_bounds = array<i64: 768, 128>}, {pipeline_mode = #tpu.pipeline_mode<synchronous>, transform_indices = @transform_2, window_bounds = array<i64: 1, 128>}, {pipeline_mode = #tpu.pipeline_mode<synchronous>, transform_indices = @transform_3, window_bounds = array<i64: 128, 128>}, {pipeline_mode = #tpu.pipeline_mode<synchronous>, transform_indices = @transform_4, window_bounds = array<i64: 1, 128>}, {transform_indices = @transform_5, window_bounds = array<i64: 8, 128>}]} {
    %c0_i32 = arith.constant 0 : i32
    %0 = arith.cmpi eq, %arg1, %c0_i32 : i32
    %1 = arith.extui %0 : i1 to i32
    %c0_i32_0 = arith.constant 0 : i32
    %2 = arith.cmpi ne, %1, %c0_i32_0 : i32
    scf.if %2 {
      %cst_10 = arith.constant 0.000000e+00 : f32
      %12 = vector.broadcast %cst_10 : f32 to vector<8x128xf32>
      %c0_11 = arith.constant 0 : index
      %c0_12 = arith.constant 0 : index
      %13 = vector.load %arg8[%c0_11, %c0_12] : memref<8x128xf32, #tpu.memory_space<vmem>>, vector<8x128xf32>
      tpu.vector_store %arg8[%c0_11, %c0_12], %12 {strides = array<i32>} : memref<8x128xf32, #tpu.memory_space<vmem>>, vector<8x128xf32>,
    } else {
    }
    %c0 = arith.constant 0 : index
    %c0_1 = arith.constant 0 : index
    %3 = vector.load %arg8[%c0, %c0_1] : memref<8x128xf32, #tpu.memory_space<vmem>>, vector<8x128xf32>
    %c0_2 = arith.constant 0 : index
    %c0_3 = arith.constant 0 : index
    %4 = vector.load %arg2[%c0_2, %c0_3] : memref<8x768xbf16, #tpu.memory_space<vmem>>, vector<8x768xbf16>
    %c0_4 = arith.constant 0 : index
    %c0_5 = arith.constant 0 : index
    %5 = vector.load %arg3[%c0_4, %c0_5] : memref<768x128xbf16, #tpu.memory_space<vmem>>, vector<768x128xbf16>
    %cst = arith.constant dense<0.000000e+00> : vector<8x128xf32>
    %6 = tpu.matmul %4, %5, %cst {dimension_numbers = #tpu.dot_dimension_numbers<[1], [0], [0], [1], [0, 0, 1, 1], [], []>} : vector<8x768xbf16>, vector<768x128xbf16>, vector<8x128xf32> -> vector<8x128xf32>
    %7 = arith.addf %3, %6 : vector<8x128xf32>
    %c0_6 = arith.constant 0 : index
    %c0_7 = arith.constant 0 : index
    %8 = vector.load %arg8[%c0_6, %c0_7] : memref<8x128xf32, #tpu.memory_space<vmem>>, vector<8x128xf32>
    tpu.vector_store %arg8[%c0_6, %c0_7], %7 {strides = array<i32>} : memref<8x128xf32, #tpu.memory_space<vmem>>, vector<8x128xf32>,
    %c0_i32_8 = arith.constant 0 : i32
    %9 = arith.cmpi eq, %arg1, %c0_i32_8 : i32
    %10 = arith.extui %9 : i1 to i32
    %c0_i32_9 = arith.constant 0 : i32
    %11 = arith.cmpi ne, %10, %c0_i32_9 : i32
    scf.if %11 {
      %c0_10 = arith.constant 0 : index
      %c0_11 = arith.constant 0 : index
      %12 = vector.load %arg8[%c0_10, %c0_11] : memref<8x128xf32, #tpu.memory_space<vmem>>, vector<8x128xf32>
      %c0_12 = arith.constant 0 : index
      %c0_13 = arith.constant 0 : index
      %13 = vector.load %arg4[%c0_12, %c0_13] : memref<1x128xf32, #tpu.memory_space<vmem>>, vector<1x128xf32>
      %14 = vector.broadcast %13 : vector<1x128xf32> to vector<8x128xf32>
      %15 = arith.addf %12, %14 : vector<8x128xf32>
      %cst_14 = arith.constant 0.000000e+00 : f32
      %16 = vector.broadcast %cst_14 : f32 to vector<8x128xf32>
      %17 = arith.maximumf %15, %16 : vector<8x128xf32>
      %18 = arith.truncf %17 : vector<8x128xf32> to vector<8x128xbf16>
      %c0_15 = arith.constant 0 : index
      %c0_16 = arith.constant 0 : index
      %19 = vector.load %arg5[%c0_15, %c0_16] : memref<128x128xbf16, #tpu.memory_space<vmem>>, vector<128x128xbf16>
      %cst_17 = arith.constant dense<0.000000e+00> : vector<8x128xf32>
      %20 = tpu.matmul %18, %19, %cst_17 {dimension_numbers = #tpu.dot_dimension_numbers<[1], [0], [0], [1], [0, 0, 1, 1], [], []>} : vector<8x128xbf16>, vector<128x128xbf16>, vector<8x128xf32> -> vector<8x128xf32>
      %c0_18 = arith.constant 0 : index
      %c0_19 = arith.constant 0 : index
      %21 = vector.load %arg6[%c0_18, %c0_19] : memref<1x128xf32, #tpu.memory_space<vmem>>, vector<1x128xf32>
      %22 = vector.broadcast %21 : vector<1x128xf32> to vector<8x128xf32>
      %23 = arith.addf %20, %22 : vector<8x128xf32>
      %c0_20 = arith.constant 0 : index
      %c0_21 = arith.constant 0 : index
      %24 = vector.load %arg7[%c0_20, %c0_21] : memref<8x128xf32, #tpu.memory_space<vmem>>, vector<8x128xf32>
      tpu.vector_store %arg7[%c0_20, %c0_21], %23 {strides = array<i32>} : memref<8x128xf32, #tpu.memory_space<vmem>>, vector<8x128xf32>,
    } else {
    }
    return
  }
  func.func @transform_0(%arg0: i32, %arg1: i32) -> (i32, i32) {
    %c0_i32 = arith.constant 0 : i32
    return %arg0, %arg1 : i32, i32
  }
  func.func @transform_1(%arg0: i32, %arg1: i32) -> (i32, i32) {
    %c0_i32 = arith.constant 0 : i32
    %c0_i32_0 = arith.constant 0 : i32
    return %arg1, %c0_i32 : i32, i32
  }
  func.func @transform_2(%arg0: i32, %arg1: i32) -> (i32, i32) {
    %c0_i32 = arith.constant 0 : i32
    %c0_i32_0 = arith.constant 0 : i32
    %c0_i32_1 = arith.constant 0 : i32
    return %c0_i32, %c0_i32_0 : i32, i32
  }
  func.func @transform_3(%arg0: i32, %arg1: i32) -> (i32, i32) {
    %c0_i32 = arith.constant 0 : i32
    %c0_i32_0 = arith.constant 0 : i32
    %c0_i32_1 = arith.constant 0 : i32
    return %c0_i32, %c0_i32_0 : i32, i32
  }
  func.func @transform_4(%arg0: i32, %arg1: i32) -> (i32, i32) {
    %c0_i32 = arith.constant 0 : i32
    %c0_i32_0 = arith.constant 0 : i32
    %c0_i32_1 = arith.constant 0 : i32
    return %c0_i32, %c0_i32_0 : i32, i32
  }
  func.func @transform_5(%arg0: i32, %arg1: i32) -> (i32, i32) {
    %c0_i32 = arith.constant 0 : i32
    %c0_i32_0 = arith.constant 0 : i32
    return %arg0, %c0_i32 : i32, i32
  }
}

</mosaic_0001>

<bundles_post_ra>
// kernel: tpu_custom_call.1
= control target key start
LH: loop header
LB: loop body
LE: loop exit
PB: predicated region body
PF: predicated region fallthrough
CT: control target
= control target key end

     0   :  { %10 = vsyncpa [#allocation4], 0  ;;  %s1160_s0 = inlined_call_operand.hbm [shape: bf16[8,768], index: 0, kind: input, shape index: {}]   ;;  %s1161_s1 = inlined_call_operand.hbm [shape: bf16[768,128], index: 1, kind: input, shape index: {}]   ;;  %s1162_s2 = inlined_call_operand.vmem [shape: f32[1,128], index: 2, kind: input, shape index: {}]   ;;  %s1163_s3 = inlined_call_operand.hbm [shape: bf16[128,128], index: 3, kind: input, shape index: {}]   ;;  %s1164_s4 = inlined_call_operand.vmem [shape: f32[1,128], index: 4, kind: input, shape index: {}]   ;;  %s1165_s5 = inlined_call_operand.hbm [shape: f32[8,128], index: 5, kind: output, shape index: {}]  }
   0x1   :  { %11 = vsyncpa [#allocation7], 0 }
   0x2   :  { %12 = vsyncpa [#allocation5], 0  ;;  %s1062_s18 = smov [#allocation6]   ;;  %s968_s22 = scalar_lea.hbm %s1161_s1, 6144 }
   0x3   :  { %s28_s19 = sshll.u32 %s1062_s18, 4  ;;  %p969_p0 = scmp.ne.s32.totalorder %s1161_s1, %s968_s22  ;;  %s29_s19 = int_to_ptr.vmem [resolvable:$true] %s28_s19 }
   0x4   :  { %p972_p1 = scmp.lt.u32.totalorder %s968_s22, %s1161_s1 }
   0x6   :  { %p974_p2 = pnand %p972_p1, %p969_p0 }
   0x8   :  { %977 = shalt.err (!%p974_p2)
}
   0x9   :  { %s978_s27 = scalar_lea.vmem %s29_s19, 6144  ;;  %p983_p4 = scmp.lt.s32.totalorder %s29_s19, %s29_s19 }
   0xa   :  { %p979_p3 = scmp.ne.s32.totalorder %s29_s19, %s978_s27  ;;  %p984_p5 = scmp.lt.s32.totalorder %s978_s27, %s978_s27 }
   0xc   :  { %p985_p6 = por %p984_p5, %p983_p4 }
   0xe   :  { %p986_p7 = pnand %p985_p6, %p979_p3 }
  0x10   :  { %989 = shalt.err (!%p986_p7)
}
  0x11   :  { %s1063_s28 = smov 64   ;;  %s1064_s29 = smov 4  }
  0x12   :  { %34 = dma.hbm_to_vmem [thread:$0]  %s1161_s1, 6144, %s29_s19, [#allocation7], %s1063_s28, %s1063_s28, %s1064_s29  }
  0x13   :  { %s1065_s7 = smov [#allocation3]   ;;  %s1066_s9 = smov [#allocation8]  }
  0x14   :  { %s19_s8 = sshll.u32 %s1065_s7, 4  ;;  %s42_s10 = sshll.u32 %s1066_s9, 4  ;;  %s20_s8 = int_to_ptr.vmem [resolvable:$true] %s19_s8  ;;  %s43_s10 = int_to_ptr.vmem [resolvable:$true] %s42_s10 }
  0x15   :  { %s990_s13 = scalar_lea.hbm %s1160_s0, 384 }
  0x16   :  { %p991_p8 = scmp.ne.s32.totalorder %s1160_s0, %s990_s13  ;;  %p994_p9 = scmp.lt.u32.totalorder %s990_s13, %s1160_s0 }
  0x18   :  { %p996_p10 = pnand %p994_p9, %p991_p8 }
  0x1a   :  { %999 = shalt.err (!%p996_p10)
}
  0x1b   :  { %s1000_s1 = scalar_lea.vmem %s20_s8, 384  ;;  %p1005_p12 = scmp.lt.s32.totalorder %s20_s8, %s20_s8 }
  0x1c   :  { %p1001_p11 = scmp.ne.s32.totalorder %s20_s8, %s1000_s1  ;;  %p1006_p13 = scmp.lt.s32.totalorder %s1000_s1, %s1000_s1 }
  0x1e   :  { %p1007_p0 = por %p1006_p13, %p1005_p12 }
  0x20   :  { %p1008_p1 = pnand %p1007_p0, %p1001_p11 }
  0x22   :  { %1011 = shalt.err (!%p1008_p1)
}
  0x23   :  { %22 = dma.hbm_to_vmem [thread:$0]  %s1160_s0, 384, %s20_s8, [#allocation4]  }
  0x24   :  { %s1012_s22 = scalar_lea.hbm %s1163_s3, 1024 }
  0x25   :  { %p1013_p2 = scmp.ne.s32.totalorder %s1163_s3, %s1012_s22  ;;  %p1016_p3 = scmp.lt.u32.totalorder %s1012_s22, %s1163_s3 }
  0x27   :  { %p1018_p4 = pnand %p1016_p3, %p1013_p2 }
  0x29   :  { %1021 = shalt.err (!%p1018_p4)
}
  0x2a   :  { %s1022_s27 = scalar_lea.vmem %s43_s10, 1024  ;;  %p1027_p6 = scmp.lt.s32.totalorder %s43_s10, %s43_s10 }
  0x2b   :  { %p1023_p5 = scmp.ne.s32.totalorder %s43_s10, %s1022_s27  ;;  %p1028_p7 = scmp.lt.s32.totalorder %s1022_s27, %s1022_s27 }
  0x2d   :  { %p1029_p8 = por %p1028_p7, %p1027_p6 }
  0x2f   :  { %p1030_p9 = pnand %p1029_p8, %p1023_p5 }
  0x31   :  { %1033 = shalt.err (!%p1030_p9)
}
  0x32   :  { %48 = dma.hbm_to_vmem [thread:$0]  %s1163_s3, 1024, %s43_s10, [#allocation7], %s1063_s28, %s1063_s28, %s1064_s29  }
  0x33   :  { %1056 = dma.done.wait [#allocation4], 384  }
  0x34   :  { %1057 = vsyncadd [#allocation4], 4294966912 }
  0x35   :  { %1058 = dma.done.wait [#allocation7], 7168  }
  0x36   :  { %1059 = vsyncadd [#allocation7], 4294960128  ;;  %v906_v0 = vld [vmem:[#allocation6 + $0x40] sm:$0xff]   ;;  %v910_v4 = vld [vmem:[#allocation6 + $0x48] sm:$0xff]   ;;  %v1067_v58 = vmov 0.0   ;;  %vm1068_vm0 = vmmov 0  }
  0x37   :  { %v907_v1 = vld [vmem:[#allocation6 + $0xc0] sm:$0xff]   ;;  %803 = vmatprep.subr.bf16.mxu0 %v906_v0  ;;  %v911_v5 = vld [vmem:[#allocation6 + $0xc8] sm:$0xff]   ;;  %v914_v8 = vld [vmem:[#allocation6 + $0x50] sm:$0xff]   ;;  %s1069_s7 = smov [#allocation9]  }
  0x38   :  { %v908_v2 = vld [vmem:[#allocation6] sm:$0xff]   ;;  %825 = vmatprep.subr.bf16.mxu1 %v907_v1  ;;  %v912_v6 = vld [vmem:[#allocation6 + $0x8] sm:$0xff]   ;;  %v915_v9 = vld [vmem:[#allocation6 + $0xd0] sm:$0xff]   ;;  %s729_s8 = sshll.u32 %s1069_s7, 4  ;;  %s730_s8 = int_to_ptr.vmem [resolvable:$true] %s729_s8 }
  0x39   :  { %v909_v3 = vld [vmem:[#allocation6 + $0x80] sm:$0xff]   ;;  %804 = vmatpush3.bf16.msra.mxu0 %v908_v2  ;;  %v913_v7 = vld [vmem:[#allocation6 + $0x88] sm:$0xff]   ;;  %v916_v10 = vld [vmem:[#allocation6 + $0x10] sm:$0xff]   ;;  %p1039_p11 = scmp.lt.s32.totalorder %s730_s8, %s730_s8 }
  0x3a   :  { %826 = vmatpush3.bf16.msra.mxu1 %v909_v3  ;;  %805 = vmatprep.subr.bf16.mxu0 %v910_v4  ;;  %v917_v11 = vld [vmem:[#allocation6 + $0x90] sm:$0xff]   ;;  %v918_v12 = vld [vmem:[#allocation6 + $0x58] sm:$0xff]   ;;  %v922_v16 = vld [vmem:[#allocation6 + $0x60] sm:$0xff]  }
  0x3b   :  { %827 = vmatprep.subr.bf16.mxu1 %v911_v5  ;;  %v919_v13 = vld [vmem:[#allocation6 + $0xd8] sm:$0xff]   ;;  %v923_v17 = vld [vmem:[#allocation6 + $0xe0] sm:$0xff]   ;;  %v926_v20 = vld [vmem:[#allocation6 + $0x68] sm:$0xff]  }
  0x3c   :  { %v920_v14 = vld [vmem:[#allocation6 + $0x18] sm:$0xff]   ;;  %v924_v18 = vld [vmem:[#allocation6 + $0x20] sm:$0xff]   ;;  %v927_v21 = vld [vmem:[#allocation6 + $0xe8] sm:$0xff]  }
  0x3d   :  { %806 = vmatpush3.bf16.msra.mxu0 %v912_v6  ;;  %v921_v15 = vld [vmem:[#allocation6 + $0x98] sm:$0xff]   ;;  %v925_v19 = vld [vmem:[#allocation6 + $0xa0] sm:$0xff]   ;;  %v928_v22 = vld [vmem:[#allocation6 + $0x28] sm:$0xff]  }
  0x3e   :  { %828 = vmatpush3.bf16.msra.mxu1 %v913_v7  ;;  %807 = vmatprep.subr.bf16.mxu0 %v914_v8  ;;  %v929_v23 = vld [vmem:[#allocation6 + $0xa8] sm:$0xff]   ;;  %v930_v24 = vld [vmem:[#allocation6 + $0x70] sm:$0xff]   ;;  %v934_v28 = vld [vmem:[#allocation6 + $0x78] sm:$0xff]  }
  0x3f   :  { %829 = vmatprep.subr.bf16.mxu1 %v915_v9  ;;  %v931_v25 = vld [vmem:[#allocation6 + $0xf0] sm:$0xff]   ;;  %v935_v29 = vld [vmem:[#allocation6 + $0xf8] sm:$0xff]   ;;  %v67_v32 = vld [vmem:[#allocation3] sm:$0xff] }
  0x40   :  { %v932_v26 = vld [vmem:[#allocation6 + $0x30] sm:$0xff]   ;;  %v936_v30 = vld [vmem:[#allocation6 + $0x38] sm:$0xff]   ;;  %v739_v34 = vcombine.low %v67_v32, %v67_v32  ;;  %v740_v35 = vcombine.high %v67_v32, %v67_v32  ;;  %v942_v38 = vld [vmem:[#allocation6 + $0x140] sm:$0xff]  }
  0x41   :  { %808 = vmatpush3.bf16.msra.mxu0 %v916_v10  ;;  %v933_v27 = vld [vmem:[#allocation6 + $0xb0] sm:$0xff]   ;;  %v937_v31 = vld [vmem:[#allocation6 + $0xb8] sm:$0xff]   ;;  %v943_v39 = vld [vmem:[#allocation6 + $0x100] sm:$0xff]  }
  0x42   :  { %830 = vmatpush3.bf16.msra.mxu1 %v917_v11  ;;  %809 = vmatprep.subr.bf16.mxu0 %v918_v12  ;;  %v68_v33 = vld [vmem:[#allocation3 + $0x8] sm:$0xff]  ;;  %v944_v40 = vld [vmem:[#allocation6 + $0x148] sm:$0xff]   ;;  %v948_v44 = vld [vmem:[#allocation6 + $0x158] sm:$0xff]  }
  0x43   :  { %831 = vmatprep.subr.bf16.mxu1 %v919_v13  ;;  %v741_v36 = vcombine.low %v68_v33, %v68_v33  ;;  %v742_v37 = vcombine.high %v68_v33, %v68_v33  ;;  %507 = vmatprep.mubr.bf16.mxu0 %v740_v35  ;;  %v945_v41 = vld [vmem:[#allocation6 + $0x108] sm:$0xff]   ;;  %v946_v42 = vld [vmem:[#allocation6 + $0x150] sm:$0xff]   ;;  %v949_v45 = vld [vmem:[#allocation6 + $0x118] sm:$0xff]  }
  0x44   :  { %v947_v43 = vld [vmem:[#allocation6 + $0x110] sm:$0xff]   ;;  %v950_v46 = vld [vmem:[#allocation6 + $0x160] sm:$0xff]   ;;  %v69_v48 = vld [vmem:[#allocation3 + $0x10] sm:$0xff] }
  0x45   :  { %810 = vmatpush3.bf16.msra.mxu0 %v920_v14  ;;  %547 = vmatprep.mubr.bf16.mxu1 %v742_v37  ;;  %v951_v47 = vld [vmem:[#allocation6 + $0x120] sm:$0xff]   ;;  %v952_v49 = vld [vmem:[#allocation6 + $0x168] sm:$0xff]   ;;  %v744_v50 = vcombine.high %v69_v48, %v69_v48  ;;  %v954_v52 = vld [vmem:[#allocation6 + $0x170] sm:$0xff]   ;;  %v743_v56 = vcombine.low %v69_v48, %v69_v48 }
  0x46   :  { %832 = vmatpush3.bf16.msra.mxu1 %v921_v15  ;;  %811 = vmatprep.subr.bf16.mxu0 %v922_v16  ;;  %v953_v51 = vld [vmem:[#allocation6 + $0x128] sm:$0xff]   ;;  %v955_v53 = vld [vmem:[#allocation6 + $0x130] sm:$0xff]   ;;  %v956_v54 = vld [vmem:[#allocation6 + $0x178] sm:$0xff]  }
  0x47   :  { %833 = vmatprep.subr.bf16.mxu1 %v923_v17  ;;  %v957_v55 = vld [vmem:[#allocation6 + $0x138] sm:$0xff]   ;;  %v960_v57 = vld [vmem:[#allocation8] sm:$0xff]   ;;  %v961_v59 = vld [vmem:[#allocation8 + $0x8] sm:$0xff]  }
  0x48   :  { %v962_v60 = vld [vmem:[#allocation8 + $0x10] sm:$0xff]   ;;  %v963_v61 = vld [vmem:[#allocation8 + $0x18] sm:$0xff]   ;;  %v964_v62 = vld [vmem:[#allocation8 + $0x20] sm:$0xff]  }
  0x49   :  { %812 = vmatpush3.bf16.msra.mxu0 %v924_v18  ;;  %v965_v63 = vld [vmem:[#allocation8 + $0x28] sm:$0xff]   ;;  %v966_v0 = vld [vmem:[#allocation8 + $0x30] sm:$0xff]   ;;  %v967_v1 = vld [vmem:[#allocation8 + $0x38] sm:$0xff]  }
  0x4a   :  { %834 = vmatpush3.bf16.msra.mxu1 %v925_v19  ;;  %813 = vmatprep.subr.bf16.mxu0 %v926_v20  ;;  %v793_v17 = vld [vmem:[%s1162_s2] ss:$0 sm:$0xff]  ;;  %s1034_s2 = scalar_lea.vmem %s730_s8, 128 }
  0x4b   :  { %835 = vmatprep.subr.bf16.mxu1 %v927_v21  ;;  %p1035_p10 = scmp.ne.s32.totalorder %s730_s8, %s1034_s2  ;;  %p1040_p12 = scmp.lt.s32.totalorder %s1034_s2, %s1034_s2 }
  0x4d   :  { %814 = vmatpush3.bf16.msra.mxu0 %v928_v22  ;;  %p1041_p13 = por %p1040_p12, %p1039_p11 }
  0x4e   :  { %836 = vmatpush3.bf16.msra.mxu1 %v929_v23  ;;  %815 = vmatprep.subr.bf16.mxu0 %v930_v24  ;;  %v794_v23 = vld [vmem:[%s1164_s4] ss:$0 sm:$0xff] }
  0x4f   :  { %837 = vmatprep.subr.bf16.mxu1 %v931_v25  ;;  %p1042_p0 = pnand %p1041_p13, %p1035_p10 }
  0x51   :  { %816 = vmatpush3.bf16.msra.mxu0 %v932_v26 }
  0x52   :  { %838 = vmatpush3.bf16.msra.mxu1 %v933_v27  ;;  %817 = vmatprep.subr.bf16.mxu0 %v934_v28 }
  0x53   :  { %839 = vmatprep.subr.bf16.mxu1 %v935_v29 }
  0x55   :  { %818 = vmatpush3.bf16.msra.mxu0 %v936_v30 }
  0x56   :  { %840 = vmatpush3.bf16.msra.mxu1 %v937_v31  ;;  %847 = vmatprep.subr.bf16.mxu0 %v942_v38 }
  0x57   :  { %878 = vmatprep.subr.bf16.mxu1 %v1067_v58 }
  0x58   :  { %508 = vmatmul.mubr.bf16.vlgmr.msra.gmra.mrb[0].mxu0 %v739_v34 }
  0x59   :  { %548 = vmatmul.mubr.bf16.vlgmr.msra.gmra.mrb[0].mxu1 %v741_v36  ;;  %848 = vmatpush3.bf16.msra.mxu0 %v943_v39 }
  0x5a   :  { %849 = vmatprep.subr.bf16.mxu0 %v944_v40  ;;  %587 = vmatprep.mubr.bf16.mxu0 %v744_v50 }
  0x5b   :  { %879 = vmatpush3.bf16.msra.mxu1 %v960_v57  ;;  %894 = vmatprep.mubr.msk.bf16.mxu1 %vm1068_vm0, %v1067_v58 }
  0x5c   :  { %880 = vmatprep.subr.bf16.mxu1 %v1067_v58 }
  0x5d   :  { %850 = vmatpush3.bf16.msra.mxu0 %v945_v41 }
  0x5e   :  { %851 = vmatprep.subr.bf16.mxu0 %v946_v42 }
  0x5f   :  { %881 = vmatpush3.bf16.msra.mxu1 %v961_v59 }
  0x60   :  { %882 = vmatprep.subr.bf16.mxu1 %v1067_v58 }
  0x61   :  { %852 = vmatpush3.bf16.msra.mxu0 %v947_v43 }
  0x62   :  { %853 = vmatprep.subr.bf16.mxu0 %v948_v44 }
  0x63   :  { %883 = vmatpush3.bf16.msra.mxu1 %v962_v60 }
  0x64   :  { %884 = vmatprep.subr.bf16.mxu1 %v1067_v58 }
  0x65   :  { %854 = vmatpush3.bf16.msra.mxu0 %v949_v45 }
  0x66   :  { %855 = vmatprep.subr.bf16.mxu0 %v950_v46 }
  0x67   :  { %885 = vmatpush3.bf16.msra.mxu1 %v963_v61 }
  0x68   :  { %886 = vmatprep.subr.bf16.mxu1 %v1067_v58 }
  0x69   :  { %856 = vmatpush3.bf16.msra.mxu0 %v951_v47 }
  0x6a   :  { %857 = vmatprep.subr.bf16.mxu0 %v952_v49 }
  0x6b   :  { %887 = vmatpush3.bf16.msra.mxu1 %v964_v62 }
  0x6c   :  { %888 = vmatprep.subr.bf16.mxu1 %v1067_v58 }
  0x6d   :  { %858 = vmatpush3.bf16.msra.mxu0 %v953_v51 }
  0x6e   :  { %859 = vmatprep.subr.bf16.mxu0 %v954_v52 }
  0x6f   :  { %889 = vmatpush3.bf16.msra.mxu1 %v965_v63 }
  0x70   :  { %890 = vmatprep.subr.bf16.mxu1 %v1067_v58 }
  0x71   :  { %860 = vmatpush3.bf16.msra.mxu0 %v955_v53 }
  0x72   :  { %861 = vmatprep.subr.bf16.mxu0 %v956_v54 }
  0x73   :  { %891 = vmatpush3.bf16.msra.mxu1 %v966_v0 }
  0x74   :  { %892 = vmatprep.subr.bf16.mxu1 %v1067_v58 }
  0x75   :  { %862 = vmatpush3.bf16.msra.mxu0 %v957_v55 }
  0x77   :  { %893 = vmatpush3.bf16.msra.mxu1 %v967_v1 }
  0x78   :  { %588 = vmatmul.mubr.bf16.vlgmr.msra.gmra.mrb[4].mxu0 %v743_v56 }
 0x12b   :  { %v819_v2 = vpop.f32.mrb[0].mxu0 }
 0x12c   :  { %v841_v3 = vpop.f32.mrb[0].mxu1  ;;  %v820_v4 = vpop.f32.mrb[1].mxu0 }
 0x12d   :  { %v842_v5 = vpop.f32.mrb[1].mxu1  ;;  %v821_v6 = vadd.f32 %v820_v4, %v819_v2  ;;  %v822_v8 = vpop.f32.mrb[2].mxu0 }
 0x12e   :  { %v843_v7 = vadd.f32 %v842_v5, %v841_v3  ;;  %v844_v9 = vpop.f32.mrb[2].mxu1  ;;  %v823_v10 = vpop.f32.mrb[3].mxu0 }
 0x12f   :  { %v845_v11 = vpop.f32.mrb[3].mxu1 }
 0x130   :  { %v550_v12 = vadd.f32 %v843_v7, %v821_v6 }
 0x14b   :  { %v863_v13 = vpop.f32.mrb[4].mxu0 }
 0x14c   :  { %v864_v14 = vpop.f32.mrb[5].mxu0 }
 0x14d   :  { %v865_v15 = vadd.f32 %v864_v14, %v863_v13  ;;  %v866_v16 = vpop.f32.mrb[6].mxu0 }
 0x14e   :  { %v867_v18 = vpop.f32.mrb[7].mxu0 }
 0x14f   :  { %v590_v19 = vadd.f32 %v865_v15, %v550_v12 }
 0x151   :  { %v608_v20 = vadd.f32 %v793_v17, %v590_v19 }
 0x153   :  { %v609_v21 = vmax.f32 %v608_v20, 0.0 }
 0x155   :  { %v610_v22 = vpack.c.bf16 %v609_v21, %v609_v21 }
 0x157   :  { %895 = vmatmul.mubr.bf16.vlgmr.msra.gmra.mrb[4].mxu1 %v610_v22 }
 0x22a   :  { %v716_v24 = vpop.f32.mrb[4].mxu1 }
 0x22b   :  { %v717_v25 = vadd.f32 %v794_v23, %v716_v24  ;;  %v896_v26 = vpop.f32.mrb[5].mxu1 }
 0x22c   :  { %v719_v27 = vpop.f32.mrb[6].mxu1 }
 0x22d   :  { %722 = vst [vmem:[#allocation9] sm:$0xff] %v717_v25  ;;  %v897_v28 = vpop.f32.mrb[7].mxu1 }
 0x22e   :  { %1045 = shalt.err (!%p1042_p0)
}
 0x22f   :  { %s1046_s4 = scalar_lea.hbm %s1165_s5, 128 }
 0x230   :  { %p1047_p1 = scmp.ne.s32.totalorder %s1165_s5, %s1046_s4  ;;  %p1050_p2 = scmp.lt.u32.totalorder %s1046_s4, %s1165_s5 }
 0x232   :  { %p1052_p3 = pnand %p1050_p2, %p1047_p1 }
 0x234   :  { %1055 = shalt.err (!%p1052_p3)
}
 0x235   :  { %732 = dma.vmem_to_hbm [thread:$0]  %s730_s8, 128, %s1165_s5, [#allocation5]  }
 0x236   :  { %1060 = dma.done.wait [#allocation5], 128  }
 0x237   :  { %1061 = vsyncadd [#allocation5], 4294967168 }
 0x238   :  { %736 = vsyncpa [#allocation4], 1 }
 0x239   :  { %737 = vsyncpa [#allocation7], 1 }
 0x23a   :  { %738 = vsyncpa [#allocation5], 1 }

</bundles_post_ra>
